<compile_context>
chip_gen: v7x
topology: tpu7x:2x2x1
jax: 0.10.0
libtpu: 0.0.40
codegen_flags: <defaults>
</compile_context>

<pallas_src>
import math
import numpy as np

import jax
import jax.numpy as jnp
from jax.experimental import pallas as pl
from jax.experimental.pallas import tpu as pltpu


# ----------------------------------------------------------------------------
# Schedule construction (numpy; mirrors make_beta_schedule / set_new_noise_schedule)
# ----------------------------------------------------------------------------
def make_beta_schedule(schedule, n_timestep, linear_start=1e-4, linear_end=2e-2):
    if schedule == "linear":
        betas = np.linspace(linear_start, linear_end, n_timestep, dtype=np.float64)
    elif schedule == "quad":
        betas = np.linspace(linear_start ** 0.5, linear_end ** 0.5, n_timestep,
                            dtype=np.float64) ** 2
    else:
        raise NotImplementedError(schedule)
    return betas


def build_schedule(n_timestep=100, linear_start=1e-4, linear_end=2e-2):
    betas = make_beta_schedule("linear", n_timestep, linear_start, linear_end)
    alphas = 1.0 - betas
    alphas_cumprod = np.cumprod(alphas, axis=0)
    sqrt_alphas_cumprod_prev = np.sqrt(np.append(1.0, alphas_cumprod))  # length T+1
    return {
        "num_timesteps": int(n_timestep),
        "sqrt_alphas_cumprod_prev": sqrt_alphas_cumprod_prev,
    }


# ----------------------------------------------------------------------------
# Fused p_losses kernel
#   grid = (B, HW // tile)
#     axis 0 (batch)   : "parallel"  -> per-batch partial losses (megacore on v7x)
#     axis 1 (spatial) : "arbitrary" -> reduction into the resident output block
# ----------------------------------------------------------------------------
def _fused_p_losses_kernel(a_sm, sq_sm, w_sm,          # SMEM scalar prefetch
                           hr_ref, sr_ref, n_ref,      # VMEM (1, C, tile) bf16
                           loss_ref):                  # VMEM (1, 1, 128) f32 per batch
    b = pl.program_id(0)
    s = pl.program_id(1)
    c_dim = hr_ref.shape[1]

    a = a_sm[b]      # continuous_sqrt_alpha_cumprod for this batch element
    sq = sq_sm[b]    # sqrt(1 - a^2), precomputed once in the wrapper

    hr = hr_ref[0].astype(jnp.float32)   # (C, tile)
    sr = sr_ref[0].astype(jnp.float32)
    nz = n_ref[0].astype(jnp.float32)

    # q_sample: x_noisy = a * x_start + sqrt(1 - a^2) * noise   (dense VPU)
    x_noisy = a * hr + sq * nz

    # denoise_fn stand-in: 1x1 conv over cat([SR, x_noisy], dim=1) + noise-level
    # FiLM bias, evaluated as unrolled scalar-broadcast FMAs.  Weights live in
    # SMEM (scalar prefetch): no MXU matmul, no concat, no VMEM weight tiles.
    # w_sm layout: [:, 0:C] = W_sr, [:, C:2C] = W_noisy, [:, 2C] = FiLM gain g.
    partial = jnp.float32(0.0)
    for o in range(c_dim):
        row = w_sm[o, 0] * sr[0:1, :] + w_sm[o, c_dim] * x_noisy[0:1, :]
        for c in range(1, c_dim):
            row = row + w_sm[o, c] * sr[c:c + 1, :]
            row = row + w_sm[o, c_dim + c] * x_noisy[c:c + 1, :]
        row = row + a * w_sm[o, 2 * c_dim]            # FiLM bias: a * g[o]
        # L1(sum) partial for this output channel
        partial = partial + jnp.sum(jnp.abs(nz[o:o + 1, :] - row))

    @pl.when(s == 0)
    def _init():
        loss_ref[...] = jnp.zeros_like(loss_ref)

    loss_ref[...] += partial       # scalar broadcast into the lane-dense block


def _pick_spatial_tile(hw, c, streamed_elem_bytes=2,
                       target_step_bytes=2 << 20, vmem_budget_bytes=24 << 20):
    """Largest lane tile (multiple of 128 dividing HW, or the full row) such that
    a grid step moves ~target_step_bytes of streamed input without exceeding a
    conservative VMEM budget (3 streamed inputs x 2 pipeline buffers + f32 temps),
    kept well under v7x's 64 MiB physical / 32 MiB scoped default."""
    streamed_per_lane = 3 * 2 * c * streamed_elem_bytes   # 3 inputs, double-buffered
    temps_per_lane = 6 * c * 4                            # f32 upcasts / x_noisy / rows
    cap = min(target_step_bytes // max(1, 3 * c * streamed_elem_bytes),
              vmem_budget_bytes // (streamed_per_lane + temps_per_lane))
    cap = max(128, int(cap))
    if hw <= cap:
        return hw                 # full-row block (block dim == array dim is legal)
    t = (cap // 128) * 128
    while t >= 128:
        if hw % t == 0:
            return t
        t -= 128
    return hw                     # pathological HW: fall back to the full row


def fused_p_losses(hr, sr, noise, cont_a, sq, w_all):
    """hr/sr/noise: (B, C, HW) bf16; cont_a/sq: (B,) f32;
       w_all: (C, 2C+1) f32 packed as [W_sr | W_noisy | film_gain]."""
    b, c, hw = hr.shape
    tile = _pick_spatial_tile(hw, c, streamed_elem_bytes=hr.dtype.itemsize)
    n_sp = hw // tile

    data_spec = pl.BlockSpec((1, c, tile), lambda bi, si, a, q, w: (bi, 0, si))
    out_spec = pl.BlockSpec((1, 1, 128), lambda bi, si, a, q, w: (bi, 0, 0))

    grid_spec = pltpu.PrefetchScalarGridSpec(
        num_scalar_prefetch=3,
        grid=(b, n_sp),
        in_specs=[data_spec, data_spec, data_spec],
        out_specs=out_spec,
    )

    partials = pl.pallas_call(
        _fused_p_losses_kernel,
        out_shape=jax.ShapeDtypeStruct((b, 1, 128), jnp.float32),
        grid_spec=grid_spec,
        compiler_params=pltpu.CompilerParams(
            dimension_semantics=("parallel", "arbitrary")),
    )(cont_a, sq, w_all, hr, sr, noise)

    # Every lane of a batch's block holds that batch's partial loss; take lane 0.
    return jnp.sum(partials[:, 0, 0])


# ----------------------------------------------------------------------------
# Randomness (shared by kernel path and reference; all on-device, jit-friendly)
# ----------------------------------------------------------------------------
def _sample_diffusion_randomness(key, sqrt_acp_prev, b, c, hw):
    key_t, key_a, key_n = jax.random.split(key, 3)
    n_timestep = sqrt_acp_prev.shape[0] - 1
    # t ~ randint(1, T+1), kept on device (no host sync / retrace)
    t = jax.random.randint(key_t, (), 1, n_timestep + 1)
    lo = sqrt_acp_prev[t - 1]
    hi = sqrt_acp_prev[t]
    u = jax.random.uniform(key_a, (b,), dtype=jnp.float32)
    cont_a = (lo + u * (hi - lo)).astype(jnp.float32)   # U(prev[t-1], prev[t]) per batch
    noise = jax.random.normal(key_n, (b, c, hw), dtype=jnp.float32)
    return cont_a, noise


# ----------------------------------------------------------------------------
# GaussianDiffusion.forward == p_losses (conditional, loss_type='l1', reduction='sum')
# ----------------------------------------------------------------------------
def gaussian_diffusion_forward(hr_img, sr_img, sqrt_acp_prev, weight, nl_gain, key):
    b, c, h, w = hr_img.shape
    hw = h * w

    cont_a, noise = _sample_diffusion_randomness(key, sqrt_acp_prev, b, c, hw)
    sq = jnp.sqrt(1.0 - cont_a * cont_a).astype(jnp.float32)

    # Stream the three image tensors as bf16 (the kernel upcasts to f32): halves
    # HBM read traffic.  The reference below uses the identical bf16-rounded values.
    hr3 = hr_img.reshape(b, c, hw).astype(jnp.bfloat16)
    sr3 = sr_img.reshape(b, c, hw).astype(jnp.bfloat16)
    nz3 = noise.astype(jnp.bfloat16)

    # Pack [W_sr | W_noisy | film_gain] for SMEM scalar prefetch; the concat over
    # channels is never materialized on the data path.
    w_all = jnp.concatenate([weight, nl_gain.reshape(c, 1)], axis=1).astype(jnp.float32)

    return fused_p_losses(hr3, sr3, nz3, cont_a, sq, w_all)


gaussian_diffusion_forward_jit = jax.jit(gaussian_diffusion_forward)


# Pure-JAX reference (identical randomness and identical bf16 input rounding).
def _reference_forward(hr_img, sr_img, sqrt_acp_prev, weight, nl_gain, key):
    b, c, h, w = hr_img.shape
    hw = h * w
    cont_a, noise = _sample_diffusion_randomness(key, sqrt_acp_prev, b, c, hw)
    a = cont_a.reshape(b, 1, 1)
    sq = jnp.sqrt(1.0 - cont_a * cont_a).reshape(b, 1, 1)

    hr3 = hr_img.reshape(b, c, hw).astype(jnp.bfloat16).astype(jnp.float32)
    sr3 = sr_img.reshape(b, c, hw).astype(jnp.bfloat16).astype(jnp.float32)
    nz3 = noise.astype(jnp.bfloat16).astype(jnp.float32)

    x_noisy = a * hr3 + sq * nz3
    x_cat = jnp.concatenate([sr3, x_noisy], axis=1)
    y = jnp.einsum("oc,bcx->box", weight, x_cat,
                   precision=jax.lax.Precision.HIGHEST) + a * nl_gain.reshape(1, c, 1)
    return jnp.sum(jnp.abs(nz3 - y))


_reference_forward_jit = jax.jit(_reference_forward)


# ----------------------------------------------------------------------------
# main
# ----------------------------------------------------------------------------
if __name__ == "__main__":
    B, C, H, W = 2, 4, 16, 16

    key = jax.random.PRNGKey(0)
    k_hr, k_sr, k_w, k_g, k_fwd = jax.random.split(key, 5)

    hr = jax.random.normal(k_hr, (B, C, H, W), dtype=jnp.float32)
    sr = jax.random.normal(k_sr, (B, C, H, W), dtype=jnp.float32)

    # TODO(synk): the real denoise_fn is an external UNet passed into
    # GaussianDiffusion; GaussianDiffusion only wraps it, so a 1x1-conv (2C->C)
    # + noise-level FiLM stand-in is used as the denoiser here.
    weight = (jax.random.normal(k_w, (C, 2 * C), dtype=jnp.float32)
              * (1.0 / math.sqrt(2 * C)))
    nl_gain = jax.random.normal(k_g, (C,), dtype=jnp.float32) * 0.1

    schedule = build_schedule(n_timestep=100, linear_start=1e-4, linear_end=2e-2)
    sqrt_acp_prev = jnp.asarray(schedule["sqrt_alphas_cumprod_prev"],
                                dtype=jnp.float32)

    loss = gaussian_diffusion_forward_jit(hr, sr, sqrt_acp_prev, weight, nl_gain,
                                          k_fwd)
    loss = jax.block_until_ready(loss)

    ref = jax.block_until_ready(
        _reference_forward_jit(hr, sr, sqrt_acp_prev, weight, nl_gain, k_fwd))

    assert jnp.isfinite(loss), "loss is not finite"
    np.testing.assert_allclose(np.asarray(loss), np.asarray(ref),
                               rtol=1e-4, atol=1e-2)
    print("KERNEL_OK")
</pallas_src>

<mosaic_0001>
module attributes {stable_mosaic.version = 11 : i64} {
  func.func @_fused_p_losses_kernel(%arg0: i32, %arg1: i32, %arg2: memref<2xf32, #tpu.memory_space<smem>>, %arg3: memref<2xf32, #tpu.memory_space<smem>>, %arg4: memref<4x9xf32, #tpu.memory_space<smem>>, %arg5: memref<1x4x256xbf16, #tpu.memory_space<vmem>>, %arg6: memref<1x4x256xbf16, #tpu.memory_space<vmem>>, %arg7: memref<1x4x256xbf16, #tpu.memory_space<vmem>>, %arg8: memref<1x1x128xf32, #tpu.memory_space<vmem>>) attributes {dimension_semantics = [#tpu.dimension_semantics<parallel>, #tpu.dimension_semantics<arbitrary>], iteration_bounds = array<i64: 2, 1>, scalar_prefetch = 3 : i64, scratch_operands = 0 : i64, tpu.core_type = #tpu.core_type<tc>, window_params = [{transform_indices = @transform_0, window_bounds = array<i64: 1, 4, 256>}, {transform_indices = @transform_1, window_bounds = array<i64: 1, 4, 256>}, {transform_indices = @transform_2, window_bounds = array<i64: 1, 4, 256>}, {transform_indices = @transform_3, window_bounds = array<i64: 1, 1, 128>}]} {
    %0 = arith.index_cast %arg0 : i32 to index
    %1 = memref.load %arg2[%0] : memref<2xf32, #tpu.memory_space<smem>>
    %2 = arith.index_cast %arg0 : i32 to index
    %3 = memref.load %arg3[%2] : memref<2xf32, #tpu.memory_space<smem>>
    %c0 = arith.constant 0 : index
    %c0_0 = arith.constant 0 : index
    %c0_1 = arith.constant 0 : index
    %4 = vector.load %arg5[%c0, %c0_0, %c0_1] : memref<1x4x256xbf16, #tpu.memory_space<vmem>>, vector<1x4x256xbf16>
    %5 = vector.shape_cast %4 : vector<1x4x256xbf16> to vector<4x256xbf16>
    %6 = arith.extf %5 : vector<4x256xbf16> to vector<4x256xf32>
    %c0_2 = arith.constant 0 : index
    %c0_3 = arith.constant 0 : index
    %c0_4 = arith.constant 0 : index
    %7 = vector.load %arg6[%c0_2, %c0_3, %c0_4] : memref<1x4x256xbf16, #tpu.memory_space<vmem>>, vector<1x4x256xbf16>
    %8 = vector.shape_cast %7 : vector<1x4x256xbf16> to vector<4x256xbf16>
    %9 = arith.extf %8 : vector<4x256xbf16> to vector<4x256xf32>
    %c0_5 = arith.constant 0 : index
    %c0_6 = arith.constant 0 : index
    %c0_7 = arith.constant 0 : index
    %10 = vector.load %arg7[%c0_5, %c0_6, %c0_7] : memref<1x4x256xbf16, #tpu.memory_space<vmem>>, vector<1x4x256xbf16>
    %11 = vector.shape_cast %10 : vector<1x4x256xbf16> to vector<4x256xbf16>
    %12 = arith.extf %11 : vector<4x256xbf16> to vector<4x256xf32>
    %13 = vector.broadcast %1 : f32 to vector<4x256xf32>
    %14 = arith.mulf %13, %6 : vector<4x256xf32>
    %15 = vector.broadcast %3 : f32 to vector<4x256xf32>
    %16 = arith.mulf %15, %12 : vector<4x256xf32>
    %17 = arith.addf %14, %16 : vector<4x256xf32>
    %c0_8 = arith.constant 0 : index
    %c0_9 = arith.constant 0 : index
    %18 = memref.load %arg4[%c0_8, %c0_9] : memref<4x9xf32, #tpu.memory_space<smem>>
    %19 = vector.extract_strided_slice %9 {offsets = [0, 0], sizes = [1, 256], strides = [1, 1]} : vector<4x256xf32> to vector<1x256xf32>
    %20 = vector.broadcast %18 : f32 to vector<1x256xf32>
    %21 = arith.mulf %20, %19 : vector<1x256xf32>
    %c0_10 = arith.constant 0 : index
    %c4 = arith.constant 4 : index
    %22 = memref.load %arg4[%c0_10, %c4] : memref<4x9xf32, #tpu.memory_space<smem>>
    %23 = vector.extract_strided_slice %17 {offsets = [0, 0], sizes = [1, 256], strides = [1, 1]} : vector<4x256xf32> to vector<1x256xf32>
    %24 = vector.broadcast %22 : f32 to vector<1x256xf32>
    %25 = arith.mulf %24, %23 : vector<1x256xf32>
    %26 = arith.addf %21, %25 : vector<1x256xf32>
    %c0_11 = arith.constant 0 : index
    %c1 = arith.constant 1 : index
    %27 = memref.load %arg4[%c0_11, %c1] : memref<4x9xf32, #tpu.memory_space<smem>>
    %28 = vector.extract_strided_slice %9 {offsets = [1, 0], sizes = [1, 256], strides = [1, 1]} : vector<4x256xf32> to vector<1x256xf32>
    %29 = vector.broadcast %27 : f32 to vector<1x256xf32>
    %30 = arith.mulf %29, %28 : vector<1x256xf32>
    %31 = arith.addf %26, %30 : vector<1x256xf32>
    %c0_12 = arith.constant 0 : index
    %c5 = arith.constant 5 : index
    %32 = memref.load %arg4[%c0_12, %c5] : memref<4x9xf32, #tpu.memory_space<smem>>
    %33 = vector.extract_strided_slice %17 {offsets = [1, 0], sizes = [1, 256], strides = [1, 1]} : vector<4x256xf32> to vector<1x256xf32>
    %34 = vector.broadcast %32 : f32 to vector<1x256xf32>
    %35 = arith.mulf %34, %33 : vector<1x256xf32>
    %36 = arith.addf %31, %35 : vector<1x256xf32>
    %c0_13 = arith.constant 0 : index
    %c2 = arith.constant 2 : index
    %37 = memref.load %arg4[%c0_13, %c2] : memref<4x9xf32, #tpu.memory_space<smem>>
    %38 = vector.extract_strided_slice %9 {offsets = [2, 0], sizes = [1, 256], strides = [1, 1]} : vector<4x256xf32> to vector<1x256xf32>
    %39 = vector.broadcast %37 : f32 to vector<1x256xf32>
    %40 = arith.mulf %39, %38 : vector<1x256xf32>
    %41 = arith.addf %36, %40 : vector<1x256xf32>
    %c0_14 = arith.constant 0 : index
    %c6 = arith.constant 6 : index
    %42 = memref.load %arg4[%c0_14, %c6] : memref<4x9xf32, #tpu.memory_space<smem>>
    %43 = vector.extract_strided_slice %17 {offsets = [2, 0], sizes = [1, 256], strides = [1, 1]} : vector<4x256xf32> to vector<1x256xf32>
    %44 = vector.broadcast %42 : f32 to vector<1x256xf32>
    %45 = arith.mulf %44, %43 : vector<1x256xf32>
    %46 = arith.addf %41, %45 : vector<1x256xf32>
    %c0_15 = arith.constant 0 : index
    %c3 = arith.constant 3 : index
    %47 = memref.load %arg4[%c0_15, %c3] : memref<4x9xf32, #tpu.memory_space<smem>>
    %48 = vector.extract_strided_slice %9 {offsets = [3, 0], sizes = [1, 256], strides = [1, 1]} : vector<4x256xf32> to vector<1x256xf32>
    %49 = vector.broadcast %47 : f32 to vector<1x256xf32>
    %50 = arith.mulf %49, %48 : vector<1x256xf32>
    %51 = arith.addf %46, %50 : vector<1x256xf32>
    %c0_16 = arith.constant 0 : index
    %c7 = arith.constant 7 : index
    %52 = memref.load %arg4[%c0_16, %c7] : memref<4x9xf32, #tpu.memory_space<smem>>
    %53 = vector.extract_strided_slice %17 {offsets = [3, 0], sizes = [1, 256], strides = [1, 1]} : vector<4x256xf32> to vector<1x256xf32>
    %54 = vector.broadcast %52 : f32 to vector<1x256xf32>
    %55 = arith.mulf %54, %53 : vector<1x256xf32>
    %56 = arith.addf %51, %55 : vector<1x256xf32>
    %c0_17 = arith.constant 0 : index
    %c8 = arith.constant 8 : index
    %57 = memref.load %arg4[%c0_17, %c8] : memref<4x9xf32, #tpu.memory_space<smem>>
    %58 = arith.mulf %1, %57 : f32
    %59 = vector.broadcast %58 : f32 to vector<1x256xf32>
    %60 = arith.addf %56, %59 : vector<1x256xf32>
    %61 = vector.extract_strided_slice %12 {offsets = [0, 0], sizes = [1, 256], strides = [1, 1]} : vector<4x256xf32> to vector<1x256xf32>
    %62 = arith.subf %61, %60 : vector<1x256xf32>
    %63 = math.absf %62 : vector<1x256xf32>
    %64 = vector.shape_cast %63 : vector<1x256xf32> to vector<1x1x256xf32>
    %cst = arith.constant dense<0.000000e+00> : vector<1xf32>
    %65 = vector.multi_reduction <add>, %64, %cst [1, 2] : vector<1x1x256xf32> to vector<1xf32>
    %66 = vector.shape_cast %65 : vector<1xf32> to vector<1x1x1xf32>
    %67 = vector.extract %66[0, 0, 0] : f32 from vector<1x1x1xf32>
    %cst_18 = arith.constant 0.000000e+00 : f32
    %68 = arith.addf %cst_18, %67 : f32
    %c1_19 = arith.constant 1 : index
    %c0_20 = arith.constant 0 : index
    %69 = memref.load %arg4[%c1_19, %c0_20] : memref<4x9xf32, #tpu.memory_space<smem>>
    %70 = vector.extract_strided_slice %9 {offsets = [0, 0], sizes = [1, 256], strides = [1, 1]} : vector<4x256xf32> to vector<1x256xf32>
    %71 = vector.broadcast %69 : f32 to vector<1x256xf32>
    %72 = arith.mulf %71, %70 : vector<1x256xf32>
    %c1_21 = arith.constant 1 : index
    %c4_22 = arith.constant 4 : index
    %73 = memref.load %arg4[%c1_21, %c4_22] : memref<4x9xf32, #tpu.memory_space<smem>>
    %74 = vector.extract_strided_slice %17 {offsets = [0, 0], sizes = [1, 256], strides = [1, 1]} : vector<4x256xf32> to vector<1x256xf32>
    %75 = vector.broadcast %73 : f32 to vector<1x256xf32>
    %76 = arith.mulf %75, %74 : vector<1x256xf32>
    %77 = arith.addf %72, %76 : vector<1x256xf32>
    %c1_23 = arith.constant 1 : index
    %c1_24 = arith.constant 1 : index
    %78 = memref.load %arg4[%c1_23, %c1_24] : memref<4x9xf32, #tpu.memory_space<smem>>
    %79 = vector.extract_strided_slice %9 {offsets = [1, 0], sizes = [1, 256], strides = [1, 1]} : vector<4x256xf32> to vector<1x256xf32>
    %80 = vector.broadcast %78 : f32 to vector<1x256xf32>
    %81 = arith.mulf %80, %79 : vector<1x256xf32>
    %82 = arith.addf %77, %81 : vector<1x256xf32>
    %c1_25 = arith.constant 1 : index
    %c5_26 = arith.constant 5 : index
    %83 = memref.load %arg4[%c1_25, %c5_26] : memref<4x9xf32, #tpu.memory_space<smem>>
    %84 = vector.extract_strided_slice %17 {offsets = [1, 0], sizes = [1, 256], strides = [1, 1]} : vector<4x256xf32> to vector<1x256xf32>
    %85 = vector.broadcast %83 : f32 to vector<1x256xf32>
    %86 = arith.mulf %85, %84 : vector<1x256xf32>
    %87 = arith.addf %82, %86 : vector<1x256xf32>
    %c1_27 = arith.constant 1 : index
    %c2_28 = arith.constant 2 : index
    %88 = memref.load %arg4[%c1_27, %c2_28] : memref<4x9xf32, #tpu.memory_space<smem>>
    %89 = vector.extract_strided_slice %9 {offsets = [2, 0], sizes = [1, 256], strides = [1, 1]} : vector<4x256xf32> to vector<1x256xf32>
    %90 = vector.broadcast %88 : f32 to vector<1x256xf32>
    %91 = arith.mulf %90, %89 : vector<1x256xf32>
    %92 = arith.addf %87, %91 : vector<1x256xf32>
    %c1_29 = arith.constant 1 : index
    %c6_30 = arith.constant 6 : index
    %93 = memref.load %arg4[%c1_29, %c6_30] : memref<4x9xf32, #tpu.memory_space<smem>>
    %94 = vector.extract_strided_slice %17 {offsets = [2, 0], sizes = [1, 256], strides = [1, 1]} : vector<4x256xf32> to vector<1x256xf32>
    %95 = vector.broadcast %93 : f32 to vector<1x256xf32>
    %96 = arith.mulf %95, %94 : vector<1x256xf32>
    %97 = arith.addf %92, %96 : vector<1x256xf32>
    %c1_31 = arith.constant 1 : index
    %c3_32 = arith.constant 3 : index
    %98 = memref.load %arg4[%c1_31, %c3_32] : memref<4x9xf32, #tpu.memory_space<smem>>
    %99 = vector.extract_strided_slice %9 {offsets = [3, 0], sizes = [1, 256], strides = [1, 1]} : vector<4x256xf32> to vector<1x256xf32>
    %100 = vector.broadcast %98 : f32 to vector<1x256xf32>
    %101 = arith.mulf %100, %99 : vector<1x256xf32>
    %102 = arith.addf %97, %101 : vector<1x256xf32>
    %c1_33 = arith.constant 1 : index
    %c7_34 = arith.constant 7 : index
    %103 = memref.load %arg4[%c1_33, %c7_34] : memref<4x9xf32, #tpu.memory_space<smem>>
    %104 = vector.extract_strided_slice %17 {offsets = [3, 0], sizes = [1, 256], strides = [1, 1]} : vector<4x256xf32> to vector<1x256xf32>
    %105 = vector.broadcast %103 : f32 to vector<1x256xf32>
    %106 = arith.mulf %105, %104 : vector<1x256xf32>
    %107 = arith.addf %102, %106 : vector<1x256xf32>
    %c1_35 = arith.constant 1 : index
    %c8_36 = arith.constant 8 : index
    %108 = memref.load %arg4[%c1_35, %c8_36] : memref<4x9xf32, #tpu.memory_space<smem>>
    %109 = arith.mulf %1, %108 : f32
    %110 = vector.broadcast %109 : f32 to vector<1x256xf32>
    %111 = arith.addf %107, %110 : vector<1x256xf32>
    %112 = vector.extract_strided_slice %12 {offsets = [1, 0], sizes = [1, 256], strides = [1, 1]} : vector<4x256xf32> to vector<1x256xf32>
    %113 = arith.subf %112, %111 : vector<1x256xf32>
    %114 = math.absf %113 : vector<1x256xf32>
    %115 = vector.shape_cast %114 : vector<1x256xf32> to vector<1x1x256xf32>
    %cst_37 = arith.constant dense<0.000000e+00> : vector<1xf32>
    %116 = vector.multi_reduction <add>, %115, %cst_37 [1, 2] : vector<1x1x256xf32> to vector<1xf32>
    %117 = vector.shape_cast %116 : vector<1xf32> to vector<1x1x1xf32>
    %118 = vector.extract %117[0, 0, 0] : f32 from vector<1x1x1xf32>
    %119 = arith.addf %68, %118 : f32
    %c2_38 = arith.constant 2 : index
    %c0_39 = arith.constant 0 : index
    %120 = memref.load %arg4[%c2_38, %c0_39] : memref<4x9xf32, #tpu.memory_space<smem>>
    %121 = vector.extract_strided_slice %9 {offsets = [0, 0], sizes = [1, 256], strides = [1, 1]} : vector<4x256xf32> to vector<1x256xf32>
    %122 = vector.broadcast %120 : f32 to vector<1x256xf32>
    %123 = arith.mulf %122, %121 : vector<1x256xf32>
    %c2_40 = arith.constant 2 : index
    %c4_41 = arith.constant 4 : index
    %124 = memref.load %arg4[%c2_40, %c4_41] : memref<4x9xf32, #tpu.memory_space<smem>>
    %125 = vector.extract_strided_slice %17 {offsets = [0, 0], sizes = [1, 256], strides = [1, 1]} : vector<4x256xf32> to vector<1x256xf32>
    %126 = vector.broadcast %124 : f32 to vector<1x256xf32>
    %127 = arith.mulf %126, %125 : vector<1x256xf32>
    %128 = arith.addf %123, %127 : vector<1x256xf32>
    %c2_42 = arith.constant 2 : index
    %c1_43 = arith.constant 1 : index
    %129 = memref.load %arg4[%c2_42, %c1_43] : memref<4x9xf32, #tpu.memory_space<smem>>
    %130 = vector.extract_strided_slice %9 {offsets = [1, 0], sizes = [1, 256], strides = [1, 1]} : vector<4x256xf32> to vector<1x256xf32>
    %131 = vector.broadcast %129 : f32 to vector<1x256xf32>
    %132 = arith.mulf %131, %130 : vector<1x256xf32>
    %133 = arith.addf %128, %132 : vector<1x256xf32>
    %c2_44 = arith.constant 2 : index
    %c5_45 = arith.constant 5 : index
    %134 = memref.load %arg4[%c2_44, %c5_45] : memref<4x9xf32, #tpu.memory_space<smem>>
    %135 = vector.extract_strided_slice %17 {offsets = [1, 0], sizes = [1, 256], strides = [1, 1]} : vector<4x256xf32> to vector<1x256xf32>
    %136 = vector.broadcast %134 : f32 to vector<1x256xf32>
    %137 = arith.mulf %136, %135 : vector<1x256xf32>
    %138 = arith.addf %133, %137 : vector<1x256xf32>
    %c2_46 = arith.constant 2 : index
    %c2_47 = arith.constant 2 : index
    %139 = memref.load %arg4[%c2_46, %c2_47] : memref<4x9xf32, #tpu.memory_space<smem>>
    %140 = vector.extract_strided_slice %9 {offsets = [2, 0], sizes = [1, 256], strides = [1, 1]} : vector<4x256xf32> to vector<1x256xf32>
    %141 = vector.broadcast %139 : f32 to vector<1x256xf32>
    %142 = arith.mulf %141, %140 : vector<1x256xf32>
    %143 = arith.addf %138, %142 : vector<1x256xf32>
    %c2_48 = arith.constant 2 : index
    %c6_49 = arith.constant 6 : index
    %144 = memref.load %arg4[%c2_48, %c6_49] : memref<4x9xf32, #tpu.memory_space<smem>>
    %145 = vector.extract_strided_slice %17 {offsets = [2, 0], sizes = [1, 256], strides = [1, 1]} : vector<4x256xf32> to vector<1x256xf32>
    %146 = vector.broadcast %144 : f32 to vector<1x256xf32>
    %147 = arith.mulf %146, %145 : vector<1x256xf32>
    %148 = arith.addf %143, %147 : vector<1x256xf32>
    %c2_50 = arith.constant 2 : index
    %c3_51 = arith.constant 3 : index
    %149 = memref.load %arg4[%c2_50, %c3_51] : memref<4x9xf32, #tpu.memory_space<smem>>
    %150 = vector.extract_strided_slice %9 {offsets = [3, 0], sizes = [1, 256], strides = [1, 1]} : vector<4x256xf32> to vector<1x256xf32>
    %151 = vector.broadcast %149 : f32 to vector<1x256xf32>
    %152 = arith.mulf %151, %150 : vector<1x256xf32>
    %153 = arith.addf %148, %152 : vector<1x256xf32>
    %c2_52 = arith.constant 2 : index
    %c7_53 = arith.constant 7 : index
    %154 = memref.load %arg4[%c2_52, %c7_53] : memref<4x9xf32, #tpu.memory_space<smem>>
    %155 = vector.extract_strided_slice %17 {offsets = [3, 0], sizes = [1, 256], strides = [1, 1]} : vector<4x256xf32> to vector<1x256xf32>
    %156 = vector.broadcast %154 : f32 to vector<1x256xf32>
    %157 = arith.mulf %156, %155 : vector<1x256xf32>
    %158 = arith.addf %153, %157 : vector<1x256xf32>
    %c2_54 = arith.constant 2 : index
    %c8_55 = arith.constant 8 : index
    %159 = memref.load %arg4[%c2_54, %c8_55] : memref<4x9xf32, #tpu.memory_space<smem>>
    %160 = arith.mulf %1, %159 : f32
    %161 = vector.broadcast %160 : f32 to vector<1x256xf32>
    %162 = arith.addf %158, %161 : vector<1x256xf32>
    %163 = vector.extract_strided_slice %12 {offsets = [2, 0], sizes = [1, 256], strides = [1, 1]} : vector<4x256xf32> to vector<1x256xf32>
    %164 = arith.subf %163, %162 : vector<1x256xf32>
    %165 = math.absf %164 : vector<1x256xf32>
    %166 = vector.shape_cast %165 : vector<1x256xf32> to vector<1x1x256xf32>
    %cst_56 = arith.constant dense<0.000000e+00> : vector<1xf32>
    %167 = vector.multi_reduction <add>, %166, %cst_56 [1, 2] : vector<1x1x256xf32> to vector<1xf32>
    %168 = vector.shape_cast %167 : vector<1xf32> to vector<1x1x1xf32>
    %169 = vector.extract %168[0, 0, 0] : f32 from vector<1x1x1xf32>
    %170 = arith.addf %119, %169 : f32
    %c3_57 = arith.constant 3 : index
    %c0_58 = arith.constant 0 : index
    %171 = memref.load %arg4[%c3_57, %c0_58] : memref<4x9xf32, #tpu.memory_space<smem>>
    %172 = vector.extract_strided_slice %9 {offsets = [0, 0], sizes = [1, 256], strides = [1, 1]} : vector<4x256xf32> to vector<1x256xf32>
    %173 = vector.broadcast %171 : f32 to vector<1x256xf32>
    %174 = arith.mulf %173, %172 : vector<1x256xf32>
    %c3_59 = arith.constant 3 : index
    %c4_60 = arith.constant 4 : index
    %175 = memref.load %arg4[%c3_59, %c4_60] : memref<4x9xf32, #tpu.memory_space<smem>>
    %176 = vector.extract_strided_slice %17 {offsets = [0, 0], sizes = [1, 256], strides = [1, 1]} : vector<4x256xf32> to vector<1x256xf32>
    %177 = vector.broadcast %175 : f32 to vector<1x256xf32>
    %178 = arith.mulf %177, %176 : vector<1x256xf32>
    %179 = arith.addf %174, %178 : vector<1x256xf32>
    %c3_61 = arith.constant 3 : index
    %c1_62 = arith.constant 1 : index
    %180 = memref.load %arg4[%c3_61, %c1_62] : memref<4x9xf32, #tpu.memory_space<smem>>
    %181 = vector.extract_strided_slice %9 {offsets = [1, 0], sizes = [1, 256], strides = [1, 1]} : vector<4x256xf32> to vector<1x256xf32>
    %182 = vector.broadcast %180 : f32 to vector<1x256xf32>
    %183 = arith.mulf %182, %181 : vector<1x256xf32>
    %184 = arith.addf %179, %183 : vector<1x256xf32>
    %c3_63 = arith.constant 3 : index
    %c5_64 = arith.constant 5 : index
    %185 = memref.load %arg4[%c3_63, %c5_64] : memref<4x9xf32, #tpu.memory_space<smem>>
    %186 = vector.extract_strided_slice %17 {offsets = [1, 0], sizes = [1, 256], strides = [1, 1]} : vector<4x256xf32> to vector<1x256xf32>
    %187 = vector.broadcast %185 : f32 to vector<1x256xf32>
    %188 = arith.mulf %187, %186 : vector<1x256xf32>
    %189 = arith.addf %184, %188 : vector<1x256xf32>
    %c3_65 = arith.constant 3 : index
    %c2_66 = arith.constant 2 : index
    %190 = memref.load %arg4[%c3_65, %c2_66] : memref<4x9xf32, #tpu.memory_space<smem>>
    %191 = vector.extract_strided_slice %9 {offsets = [2, 0], sizes = [1, 256], strides = [1, 1]} : vector<4x256xf32> to vector<1x256xf32>
    %192 = vector.broadcast %190 : f32 to vector<1x256xf32>
    %193 = arith.mulf %192, %191 : vector<1x256xf32>
    %194 = arith.addf %189, %193 : vector<1x256xf32>
    %c3_67 = arith.constant 3 : index
    %c6_68 = arith.constant 6 : index
    %195 = memref.load %arg4[%c3_67, %c6_68] : memref<4x9xf32, #tpu.memory_space<smem>>
    %196 = vector.extract_strided_slice %17 {offsets = [2, 0], sizes = [1, 256], strides = [1, 1]} : vector<4x256xf32> to vector<1x256xf32>
    %197 = vector.broadcast %195 : f32 to vector<1x256xf32>
    %198 = arith.mulf %197, %196 : vector<1x256xf32>
    %199 = arith.addf %194, %198 : vector<1x256xf32>
    %c3_69 = arith.constant 3 : index
    %c3_70 = arith.constant 3 : index
    %200 = memref.load %arg4[%c3_69, %c3_70] : memref<4x9xf32, #tpu.memory_space<smem>>
    %201 = vector.extract_strided_slice %9 {offsets = [3, 0], sizes = [1, 256], strides = [1, 1]} : vector<4x256xf32> to vector<1x256xf32>
    %202 = vector.broadcast %200 : f32 to vector<1x256xf32>
    %203 = arith.mulf %202, %201 : vector<1x256xf32>
    %204 = arith.addf %199, %203 : vector<1x256xf32>
    %c3_71 = arith.constant 3 : index
    %c7_72 = arith.constant 7 : index
    %205 = memref.load %arg4[%c3_71, %c7_72] : memref<4x9xf32, #tpu.memory_space<smem>>
    %206 = vector.extract_strided_slice %17 {offsets = [3, 0], sizes = [1, 256], strides = [1, 1]} : vector<4x256xf32> to vector<1x256xf32>
    %207 = vector.broadcast %205 : f32 to vector<1x256xf32>
    %208 = arith.mulf %207, %206 : vector<1x256xf32>
    %209 = arith.addf %204, %208 : vector<1x256xf32>
    %c3_73 = arith.constant 3 : index
    %c8_74 = arith.constant 8 : index
    %210 = memref.load %arg4[%c3_73, %c8_74] : memref<4x9xf32, #tpu.memory_space<smem>>
    %211 = arith.mulf %1, %210 : f32
    %212 = vector.broadcast %211 : f32 to vector<1x256xf32>
    %213 = arith.addf %209, %212 : vector<1x256xf32>
    %214 = vector.extract_strided_slice %12 {offsets = [3, 0], sizes = [1, 256], strides = [1, 1]} : vector<4x256xf32> to vector<1x256xf32>
    %215 = arith.subf %214, %213 : vector<1x256xf32>
    %216 = math.absf %215 : vector<1x256xf32>
    %217 = vector.shape_cast %216 : vector<1x256xf32> to vector<1x1x256xf32>
    %cst_75 = arith.constant dense<0.000000e+00> : vector<1xf32>
    %218 = vector.multi_reduction <add>, %217, %cst_75 [1, 2] : vector<1x1x256xf32> to vector<1xf32>
    %219 = vector.shape_cast %218 : vector<1xf32> to vector<1x1x1xf32>
    %220 = vector.extract %219[0, 0, 0] : f32 from vector<1x1x1xf32>
    %221 = arith.addf %170, %220 : f32
    %c0_i32 = arith.constant 0 : i32
    %222 = arith.cmpi eq, %arg1, %c0_i32 : i32
    %223 = arith.extui %222 : i1 to i32
    %c0_i32_76 = arith.constant 0 : i32
    %224 = arith.cmpi ne, %223, %c0_i32_76 : i32
    scf.if %224 {
      %cst_83 = arith.constant 0.000000e+00 : f32
      %229 = vector.broadcast %cst_83 : f32 to vector<1x1x128xf32>
      %c0_84 = arith.constant 0 : index
      %c0_85 = arith.constant 0 : index
      %c0_86 = arith.constant 0 : index
      %230 = vector.load %arg8[%c0_84, %c0_85, %c0_86] : memref<1x1x128xf32, #tpu.memory_space<vmem>>, vector<1x1x128xf32>
      tpu.vector_store %arg8[%c0_84, %c0_85, %c0_86], %229 {strides = array<i32>} : memref<1x1x128xf32, #tpu.memory_space<vmem>>, vector<1x1x128xf32>,
    } else {
    }
    %c0_77 = arith.constant 0 : index
    %c0_78 = arith.constant 0 : index
    %c0_79 = arith.constant 0 : index
    %225 = vector.load %arg8[%c0_77, %c0_78, %c0_79] : memref<1x1x128xf32, #tpu.memory_space<vmem>>, vector<1x1x128xf32>
    %226 = vector.broadcast %221 : f32 to vector<1x1x128xf32>
    %227 = arith.addf %225, %226 : vector<1x1x128xf32>
    %c0_80 = arith.constant 0 : index
    %c0_81 = arith.constant 0 : index
    %c0_82 = arith.constant 0 : index
    %228 = vector.load %arg8[%c0_80, %c0_81, %c0_82] : memref<1x1x128xf32, #tpu.memory_space<vmem>>, vector<1x1x128xf32>
    tpu.vector_store %arg8[%c0_80, %c0_81, %c0_82], %227 {strides = array<i32>} : memref<1x1x128xf32, #tpu.memory_space<vmem>>, vector<1x1x128xf32>,
    return
  }
  func.func @transform_0(%arg0: i32, %arg1: i32, %arg2: memref<2xf32, #tpu.memory_space<smem>>, %arg3: memref<2xf32, #tpu.memory_space<smem>>, %arg4: memref<4x9xf32, #tpu.memory_space<smem>>) -> (i32, i32, i32) {
    %c0_i32 = arith.constant 0 : i32
    %c0_i32_0 = arith.constant 0 : i32
    return %arg0, %c0_i32, %arg1 : i32, i32, i32
  }
  func.func @transform_1(%arg0: i32, %arg1: i32, %arg2: memref<2xf32, #tpu.memory_space<smem>>, %arg3: memref<2xf32, #tpu.memory_space<smem>>, %arg4: memref<4x9xf32, #tpu.memory_space<smem>>) -> (i32, i32, i32) {
    %c0_i32 = arith.constant 0 : i32
    %c0_i32_0 = arith.constant 0 : i32
    return %arg0, %c0_i32, %arg1 : i32, i32, i32
  }
  func.func @transform_2(%arg0: i32, %arg1: i32, %arg2: memref<2xf32, #tpu.memory_space<smem>>, %arg3: memref<2xf32, #tpu.memory_space<smem>>, %arg4: memref<4x9xf32, #tpu.memory_space<smem>>) -> (i32, i32, i32) {
    %c0_i32 = arith.constant 0 : i32
    %c0_i32_0 = arith.constant 0 : i32
    return %arg0, %c0_i32, %arg1 : i32, i32, i32
  }
  func.func @transform_3(%arg0: i32, %arg1: i32, %arg2: memref<2xf32, #tpu.memory_space<smem>>, %arg3: memref<2xf32, #tpu.memory_space<smem>>, %arg4: memref<4x9xf32, #tpu.memory_space<smem>>) -> (i32, i32, i32) {
    %c0_i32 = arith.constant 0 : i32
    %c0_i32_0 = arith.constant 0 : i32
    %c0_i32_1 = arith.constant 0 : i32
    return %arg0, %c0_i32, %c0_i32_0 : i32, i32, i32
  }
}

</mosaic_0001>

<bundles_post_ra>
// kernel: gaussian_diffusion_forward.1
= control target key start
LH: loop header
LB: loop body
LE: loop exit
PB: predicated region body
PF: predicated region fallthrough
CT: control target
= control target key end

     0   :  { %s1206_s0 = inlined_call_operand.vmem [shape: f32[2], index: 0, kind: input, shape index: {}]   ;;  %s1207_s3 = inlined_call_operand.vmem [shape: bf16[2,4,256], index: 3, kind: input, shape index: {}]   ;;  %s1208_s4 = inlined_call_operand.vmem [shape: bf16[2,4,256], index: 4, kind: input, shape index: {}]   ;;  %s1209_s5 = inlined_call_operand.vmem [shape: bf16[2,4,256], index: 5, kind: input, shape index: {}]   ;;  %s1210_s6 = inlined_call_operand.vmem [shape: f32[2,1,128], index: 6, kind: output, shape index: {}]   ;;  %s1211_s1 = inlined_call_operand.vmem [shape: f32[2], index: 1, kind: input, shape index: {}]   ;;  %s1212_s2 = inlined_call_operand.vmem [shape: f32[4,9], index: 2, kind: input, shape index: {}]  }
   0x1   :  { %s11_s23 = sshll.u32 %s1206_s0, 4  ;;  %s15_s26 = sshll.u32 %s1211_s1, 4  ;;  %s12_s23 = int_to_ptr.vmem [resolvable:$true] %s11_s23  ;;  %s16_s26 = int_to_ptr.vmem [resolvable:$true] %s15_s26 }
   0x2   :  { %s864_s27 = scalar_lea.vmem %s12_s23, 16  ;;  %p869_p1 = scmp.lt.s32.totalorder %s12_s23, %s12_s23 }
   0x3   :  { %p865_p0 = scmp.ne.s32.totalorder %s12_s23, %s864_s27  ;;  %p870_p2 = scmp.lt.s32.totalorder %s864_s27, %s864_s27 }
   0x5   :  { %p871_p3 = por %p870_p2, %p869_p1 }
   0x7   :  { %p872_p4 = pnand %p871_p3, %p865_p0 }
   0x9   :  { %875 = shalt.err (!%p872_p4)  }
   0xa   :  { %s926_s28 = smov [#allocation3]   ;;  %s876_s29 = scalar_lea.vmem %s16_s26, 16 }
   0xb   :  { %14 = dma.vmem_to_smem %s12_s23, 16, %s926_s28, [#allocation2] }
   0xc   :  { %p877_p5 = scmp.ne.s32.totalorder %s16_s26, %s876_s29  ;;  %p881_p6 = scmp.lt.s32.totalorder %s16_s26, %s16_s26 }
   0xd   :  { %p882_p7 = scmp.lt.s32.totalorder %s876_s29, %s876_s29 }
   0xf   :  { %p883_p8 = por %p882_p7, %p881_p6 }
  0x11   :  { %p884_p9 = pnand %p883_p8, %p877_p5 }
  0x13   :  { %887 = shalt.err (!%p884_p9)  }
  0x14   :  { %s927_s0 = smov [#allocation4]   ;;  %s19_s7 = sshll.u32 %s1212_s2, 4  ;;  %s20_s7 = int_to_ptr.vmem [resolvable:$true] %s19_s7 }
  0x15   :  { %18 = dma.vmem_to_smem %s16_s26, 16, %s927_s0, [#allocation2] }
  0x16   :  { %s888_s8 = scalar_lea.vmem %s20_s7, 64  ;;  %p893_p11 = scmp.lt.s32.totalorder %s20_s7, %s20_s7 }
  0x17   :  { %p889_p10 = scmp.ne.s32.totalorder %s20_s7, %s888_s8  ;;  %p894_p12 = scmp.lt.s32.totalorder %s888_s8, %s888_s8 }
  0x19   :  { %p895_p13 = por %p894_p12, %p893_p11 }
  0x1b   :  { %p896_p0 = pnand %p895_p13, %p889_p10 }
  0x1d   :  { %899 = shalt.err (!%p896_p0)  }
  0x1e   :  { %s928_s9 = smov [#allocation5]  }
  0x1f   :  { %22 = dma.vmem_to_smem %s20_s7, 64, %s928_s9, [#allocation2] }
  0x20   :  { %912 = dma.done.wait [#allocation2], 96 }
  0x21   :  { %913 = vsyncadd [#allocation2], 4294967200 }
  0x22   :  { %24 = sfence }
  0x23   :  { %s974_s10 = smov 0   ;;  %s976_s11 = smov 0  }
  0x24   :  { %s978_s12 = smov 0  }
  0x25 LB: > { %s42_s2 = sadd.s32 1, %s920_s11  ;;  %p757_p1 = scmp.ge.s32.totalorder %s924_s12, 1  ;;  %s924_s12 = sphi %s978_s12, %s30_s12   ;;  %s920_s11 = sphi %s976_s11, %s1214_s11   ;;  %s916_s10 = sphi %s974_s10, %s1213_s10  }
  0x26   : > { %p44_p2 = scmp.ge.s32.totalorder %s42_s2, 2  ;;  %p207_p3 = scmp.lt.s32.totalorder %s924_s12, 3 }
  0x28   : > { %s1216_s2 = smov (%p44_p2, %s42_s2), 0  ;;  %p208_p4 = pnand %p757_p1, %p207_p3 }
  0x29   : > { %p252_p5 = scmp.lt.s32.totalorder (!%p208_p4), %s916_s10, 1  ;;  %s992_s13 = sld [smem:[#allocation3 + %s916_s10]] (!%p208_p4)  ;;  %v359_v0 = vlaneseq (!%p208_p4)  ;;  %vm369_vm0 = vcmask (!%p208_p4), 1040384  }
  0x2a   : > { %211 = sbr.rel (%p208_p4) target bundleno = 317 (0x13d), region = 32  ;;  %s285_s14 = sld [smem:[#allocation4 + %s916_s10]] (!%p208_p4) }
  0x2b   : > { %s994_s15 = sld [smem:[#allocation5]] (!%p208_p4)  ;;  %s998_s16 = sld [smem:[#allocation5 + $0x4]] (!%p208_p4)  ;;  %v1009_v1 = vshrl.u32 (!%p208_p4), %v359_v0, 7 }
  0x2c   : > { %s765_s17 = sld [smem:[#allocation5 + $0x1]] (!%p208_p4)  ;;  %s1001_s19 = sld [smem:[#allocation5 + $0x5]] (!%p208_p4) }
  0x2d   : > { %s1015_s29 = sld [smem:[#allocation5 + $0x2]] (!%p208_p4)  ;;  %s1019_s0 = sld [smem:[#allocation5 + $0x6]] (!%p208_p4)  ;;  %v361_v15 = vsub.s32 (!%p208_p4), 0, %v1009_v1  ;;  %v365_v18 = vsub.s32 (!%p208_p4), 4, %v1009_v1  ;;  %v538_v19 = vsub.s32 (!%p208_p4), 2, %v1009_v1  ;;  %v542_v23 = vsub.s32 (!%p208_p4), 6, %v1009_v1 }
  0x2e   : > { %s1021_s1 = sld [smem:[#allocation5 + $0x3]] (!%p208_p4)  ;;  %s1025_s30 = sld [smem:[#allocation5 + $0x7]] (!%p208_p4) }
  0x2f   : > { %v292_v4 = vstv (!%p208_p4), %s992_s13  ;;  %s1027_s7 = sld [smem:[#allocation5 + $0x8]] (!%p208_p4)  ;;  %s1032_s9 = sld [smem:[#allocation5 + $0x104]] (!%p208_p4) }
  0x30   : > { %v294_v8 = vstv (!%p208_p4), %s285_s14  ;;  %s1030_s8 = sld [smem:[#allocation5 + $0x100]] (!%p208_p4)  ;;  %s1037_s14 = sld [smem:[#allocation5 + $0x101]] (!%p208_p4) }
  0x31   : > { %s1218_s10 = smov (!%p252_p5, %s916_s10), 1  ;;  %v298_v11 = vstv %s994_s15  ;;  %v301_v16 = vstv %s998_s16  ;;  %s1044_s15 = sld [smem:[#allocation5 + $0x102]] }
  0x32   : > { %s825_s18 = sshll.u32 %s1218_s10, 2  ;;  %v305_v12 = vstv %s765_s17  ;;  %v313_v17 = vstv %s1001_s19  ;;  %s1051_s17 = sld [smem:[#allocation5 + $0x106]] }
  0x33   : > { %s259_s22 = scalar_lea.vmem %s1207_s3, %s825_s18  ;;  %s269_s25 = scalar_lea.vmem %s1208_s4, %s825_s18  ;;  %v321_v22 = vstv %s1015_s29  ;;  %v329_v26 = vstv %s1019_s0 }
  0x34   : > { %s279_s28 = scalar_lea.vmem %s1209_s5, %s825_s18  ;;  %v286_v2 = vld [vmem:[%s259_s22] sm:$0xf]  ;;  %s1039_s18 = sld [smem:[#allocation5 + $0x105]]  ;;  %v337_v27 = vstv %s1021_s1  ;;  %v345_v33 = vstv %s1025_s30 }
  0x35   : > { %v288_v3 = vld [vmem:[%s269_s25] sm:$0xf]  ;;  %v287_v5 = vunpack.c.l.bf16 %v286_v2  ;;  %s1053_s20 = sld [smem:[#allocation5 + $0x103]]  ;;  %s1059_s16 = sld [smem:[#allocation5 + $0x108]]  ;;  %v475_v35 = vstv %s1032_s9 }
  0x36   : > { %v1017_v6 = vunpack.c.l.bf16 %v288_v3  ;;  %v290_v7 = vld [vmem:[%s279_s28] sm:$0xf]  ;;  %s353_s19 = smul.f32 %s1027_s7, %s992_s13  ;;  %s1067_s21 = sld [smem:[#allocation5 + $0x107]]  ;;  %v472_v34 = vstv %s1030_s8  ;;  %v479_v45 = vstv %s1037_s14 }
  0x37   : > { %v1023_v9 = vunpack.c.l.bf16 %v290_v7  ;;  %v293_v10 = vmul.f32 %v292_v4, %v287_v5  ;;  %s1072_s22 = sld [smem:[#allocation5 + $0x80]]  ;;  %s1074_s23 = sld [smem:[#allocation5 + $0x84]]  ;;  %v495_v47 = vstv %s1044_s15 }
  0x38   : > { %v306_v14 = vmul.f32 %v305_v12, %v1017_v6  ;;  %v299_v21 = vmul.f32 %v298_v11, %v1017_v6  ;;  %v322_v25 = vmul.f32 %v321_v22, %v1017_v6  ;;  %v338_v31 = vmul.f32 %v337_v27, %v1017_v6  ;;  %s1076_s24 = sld [smem:[#allocation5 + $0x81]]  ;;  %s1086_s25 = sld [smem:[#allocation5 + $0x85]] }
  0x39   : > { %v295_v13 = vmul.f32 %v294_v8, %v1023_v9  ;;  %v1079_v41 = vstv %s353_s19  ;;  %v473_v42 = vmul.f32 %v472_v34, %v1017_v6  ;;  %s1088_s26 = sld [smem:[#allocation5 + $0x82]]  ;;  %v480_v50 = vmul.f32 %v479_v45, %v1017_v6  ;;  %s1094_s28 = sld [smem:[#allocation5 + $0x88]] }
  0x3a   : > { %v766_v24 = vrot.slane %v306_v14, 9  ;;  %v770_v32 = vrot.slane %v322_v25, 10  ;;  %v774_v39 = vrot.slane %v338_v31, 11  ;;  %v487_v46 = vstv %s1039_s18  ;;  %s1099_s29 = sld [smem:[#allocation5 + $0x86]]  ;;  %s1101_s0 = sld [smem:[#allocation5 + $0x83]] }
  0x3b   : > { %v1047_v20 = vadd.f32 %v295_v13, %v293_v10  ;;  %s527_s27 = smul.f32 %s1059_s16, %s992_s13  ;;  %v496_v53 = vmul.f32 %v495_v47, %v1017_v6  ;;  %v503_v54 = vstv %s1051_s17  ;;  %v511_v55 = vstv %s1053_s20  ;;  %s1106_s1 = sld [smem:[#allocation5 + $0x87]] }
  0x3c   : > { %v796_v56 = vrot.slane %v480_v50, 9  ;;  %v512_v59 = vmul.f32 %v511_v55, %v1017_v6  ;;  %v519_v62 = vstv %s1067_s21  ;;  %s1112_s30 = sld [smem:[#allocation5 + $0x180]]  ;;  %s1116_s7 = sld [smem:[#allocation5 + $0x184]] }
  0x3d   : > { %v302_v28 = vmul.f32 %v301_v16, %v1047_v20  ;;  %v314_v29 = vmul.f32 %v313_v17, %v1047_v20  ;;  %v330_v30 = vmul.f32 %v329_v26, %v1047_v20  ;;  %v346_v40 = vmul.f32 %v345_v33, %v1047_v20  ;;  %s1121_s8 = sld [smem:[#allocation5 + $0x181]]  ;;  %s1123_s9 = sld [smem:[#allocation5 + $0x185]] }
  0x3e   : > { %v476_v43 = vmul.f32 %v475_v35, %v1047_v20  ;;  %v488_v51 = vmul.f32 %v487_v46, %v1047_v20  ;;  %v504_v58 = vmul.f32 %v503_v54, %v1047_v20  ;;  %v800_v61 = vrot.slane %v496_v53, 10  ;;  %s1129_s18 = sld [smem:[#allocation5 + $0x182]]  ;;  %s1137_s15 = sld [smem:[#allocation5 + $0x186]] }
  0x3f   : > { %v303_v36 = vadd.f32 %v302_v28, %v299_v21  ;;  %v768_v37 = vrot.slane %v314_v29, 9  ;;  %v772_v38 = vrot.slane %v330_v30, 10  ;;  %v776_v48 = vrot.slane %v346_v40, 11  ;;  %s439_s14 = smul.f32 %s1094_s28, %s992_s13  ;;  %s1142_s17 = sld [smem:[#allocation5 + $0x183]] }
  0x40   : > { %v477_v49 = vadd.f32 %v476_v43, %v473_v42  ;;  %v798_v57 = vrot.slane %v488_v51, 9  ;;  %v528_v63 = vstv %s527_s27  ;;  %v802_v2 = vrot.slane %v504_v58, 10  ;;  %s1146_s20 = sld [smem:[#allocation5 + $0x187]]  ;;  %s1157_s16 = sld [smem:[#allocation5 + $0x188]] }
  0x41   : > { %v311_v44 = vadd.f32 %v766_v24, %v303_v36  ;;  %v804_v3 = vrot.slane %v512_v59, 11  ;;  %v520_v4 = vmul.f32 %v519_v62, %v1047_v20  ;;  %v384_v7 = vstv %s1072_s22  ;;  %s1192_s22 = scalar_lea.vmem %s1210_s6, %s1218_s10 }
  0x42   : > { %v485_v0 = vadd.f32 %v796_v56, %v477_v49  ;;  %v387_v8 = vstv %s1074_s23  ;;  %v391_v10 = vstv %s1076_s24  ;;  %v385_v13 = vmul.f32 %v384_v7, %v1017_v6 }
  0x43   : > { %v319_v52 = vadd.f32 %v768_v37, %v311_v44  ;;  %v806_v12 = vrot.slane %v520_v4, 11  ;;  %v388_v14 = vmul.f32 %v387_v8, %v1047_v20  ;;  %v392_v17 = vmul.f32 %v391_v10, %v1017_v6 }
  0x44   : > { %v493_v11 = vadd.f32 %v798_v57, %v485_v0  ;;  %v399_v21 = vstv %s1086_s25  ;;  %v407_v22 = vstv %s1088_s26  ;;  %v415_v30 = vstv %s1099_s29 }
  0x45   : > { %v327_v60 = vadd.f32 %v770_v32, %v319_v52  ;;  %v389_v25 = vadd.f32 %v388_v14, %v385_v13  ;;  %v400_v26 = vmul.f32 %v399_v21, %v1047_v20  ;;  %v408_v27 = vmul.f32 %v407_v22, %v1017_v6 }
  0x46   : > { %v501_v24 = vadd.f32 %v800_v61, %v493_v11  ;;  %v781_v29 = vrot.slane %v392_v17, 9  ;;  %v423_v31 = vstv %s1101_s0  ;;  %v416_v35 = vmul.f32 %v415_v30, %v1047_v20  ;;  %s615_s19 = smul.f32 %s1157_s16, %s992_s13 }
  0x47   : > { %v335_v5 = vadd.f32 %v772_v38, %v327_v60  ;;  %v783_v33 = vrot.slane %v400_v26, 9  ;;  %v785_v34 = vrot.slane %v408_v27, 10  ;;  %v424_v38 = vmul.f32 %v423_v31, %v1017_v6 }
  0x48   : > { %v509_v32 = vadd.f32 %v802_v2, %v501_v24  ;;  %v397_v37 = vadd.f32 %v781_v29, %v389_v25  ;;  %v787_v42 = vrot.slane %v416_v35, 10  ;;  %v440_v44 = vstv %s439_s14 }
  0x49   : > { %v343_v16 = vadd.f32 %v774_v39, %v335_v5  ;;  %v431_v39 = vstv %s1106_s1  ;;  %v789_v47 = vrot.slane %v424_v38, 11  ;;  %v563_v51 = vstv %s1116_s7 }
  0x4a   : > { %v517_v40 = vadd.f32 %v804_v3, %v509_v32  ;;  %v432_v43 = vmul.f32 %v431_v39, %v1047_v20  ;;  %v405_v46 = vadd.f32 %v783_v33, %v397_v37  ;;  %v564_v54 = vmul.f32 %v563_v51, %v1047_v20 }
  0x4b   : > { %v351_v28 = vadd.f32 %v776_v48, %v343_v16  ;;  %v567_v55 = vstv %s1121_s8  ;;  %v575_v58 = vstv %s1123_s9  ;;  %v583_v59 = vstv %s1129_s18 }
  0x4c   : > { %v525_v48 = vadd.f32 %v806_v12, %v517_v40  ;;  %v791_v49 = vrot.slane %v432_v43, 11  ;;  %v413_v53 = vadd.f32 %v785_v34, %v405_v46  ;;  %v568_v57 = vmul.f32 %v567_v55, %v1017_v6 }
  0x4d   : > { %v355_v36 = vadd.f32 %v1079_v41, %v351_v28  ;;  %v560_v41 = vstv %s1112_s30  ;;  %v584_v4 = vmul.f32 %v583_v59, %v1017_v6  ;;  %v591_v8 = vstv %s1137_s15 }
  0x4e   : > { %v561_v50 = vmul.f32 %v560_v41, %v1017_v6  ;;  %v529_v56 = vadd.f32 %v528_v63, %v525_v48  ;;  %v421_v62 = vadd.f32 %v787_v42, %v413_v53  ;;  %v811_v3 = vrot.slane %v568_v57, 9 }
  0x4f   : > { %v356_v45 = vsub.f32 %v1023_v9, %v355_v36  ;;  %v576_v63 = vmul.f32 %v575_v58, %v1047_v20  ;;  %v815_v14 = vrot.slane %v584_v4, 10  ;;  %v592_v16 = vmul.f32 %v591_v8, %v1047_v20 }
  0x50   : > { %v565_v0 = vadd.f32 %v564_v54, %v561_v50  ;;  %v531_v2 = vrot.slane %v529_v56, 6  ;;  %v599_v17 = vstv %s1142_s17  ;;  %v607_v25 = vstv %s1146_s20 }
  0x51   : > { %v357_v52 = vand.u32 2147483647, %v356_v45  ;;  %v813_v12 = vrot.slane %v576_v63, 9  ;;  %v600_v24 = vmul.f32 %v599_v17, %v1017_v6  ;;  %v817_v27 = vrot.slane %v592_v16, 10 }
  0x52   : > { %v573_v11 = vadd.f32 %v811_v3, %v565_v0  ;;  %v608_v28 = vmul.f32 %v607_v25, %v1047_v20  ;;  %v450_v20 = vsub.s32 1, %v1009_v1  ;;  %v616_v40 = vstv %s615_s19 }
  0x53   : > { %v362_v60 = vrot.slane %v357_v52, %v361_v15  ;;  %v366_v61 = vrot.slane %v357_v52, %v365_v18  ;;  %v429_v15 = vadd.f32 %v789_v47, %v421_v62  ;;  %v533_v18 = vsub.f32 %v1023_v9, %v531_v2 }
  0x54   : > { %v581_v22 = vadd.f32 %v813_v12, %v573_v11  ;;  %v819_v32 = vrot.slane %v600_v24, 11  ;;  %v821_v36 = vrot.slane %v608_v28, 11  ;;  %v626_v50 = vsub.s32 3, %v1009_v1 }
  0x55   : > { %v370_v5 = vsel %vm369_vm0, %v362_v60, 0.0  ;;  %v371_v7 = vsel %vm369_vm0, %v366_v61, 0.0  ;;  %v437_v13 = vadd.f32 %v791_v49, %v429_v15  ;;  %v534_v21 = vand.u32 2147483647, %v533_v18 }
  0x56   : > { %v372_v10 = vadd.f32 %v371_v7, %v370_v5  ;;  %v589_v31 = vadd.f32 %v815_v14, %v581_v22  ;;  %v630_v51 = vsub.s32 7, %v1009_v1 }
  0x57   : > { %v441_v26 = vadd.f32 %v440_v44, %v437_v13  ;;  %v539_v29 = vrot.slane %v534_v21, %v538_v19  ;;  %v543_v30 = vrot.slane %v534_v21, %v542_v23  ;;  %v454_v19 = vsub.s32 5, %v1009_v1 }
  0x58   : > { %373 = vadd.xlane.f32.xlu0 %v372_v10  ;;  %v597_v6 = vadd.f32 %v817_v27, %v589_v31 }
  0x59   : > { %v443_v33 = vrot.slane %v441_v26, 7  ;;  %v546_v34 = vsel %vm369_vm0, %v539_v29, 0.0  ;;  %v547_v35 = vsel %vm369_vm0, %v543_v30, 0.0 }
  0x5a   : > { %v548_v37 = vadd.f32 %v547_v35, %v546_v34  ;;  %v605_v39 = vadd.f32 %v819_v32, %v597_v6 }
  0x5b   : > { %v445_v38 = vsub.f32 %v1023_v9, %v443_v33 }
  0x5c   : > { %549 = vadd.xlane.f32.xlu1 %v548_v37  ;;  %v613_v42 = vadd.f32 %v821_v36, %v605_v39 }
  0x5d   : > { %v446_v23 = vand.u32 2147483647, %v445_v38 }
  0x5e   : > { %v617_v45 = vadd.f32 %v616_v40, %v613_v42 }
  0x5f   : > { %v451_v43 = vrot.slane %v446_v23, %v450_v20  ;;  %v455_v44 = vrot.slane %v446_v23, %v454_v19 }
  0x60   : > { %v619_v48 = vrot.slane %v617_v45, 5 }
  0x61   : > { %v458_v46 = vsel %vm369_vm0, %v451_v43, 0.0  ;;  %v459_v47 = vsel %vm369_vm0, %v455_v44, 0.0 }
  0x62   : > { %v460_v41 = vadd.f32 %v459_v47, %v458_v46  ;;  %v621_v49 = vsub.f32 %v1023_v9, %v619_v48  ;;  %v929_v9 = vmov 0.0  }
  0x63   : > { %651 = vst [vmem:[%s1192_s22] sm:$0x1] %v929_v9 }
  0x64   : > { %461 = vadd.xlane.f32.xlu0 %v460_v41  ;;  %v622_v52 = vand.u32 2147483647, %v621_v49 }
  0x66   : > { %v627_v53 = vrot.slane %v622_v52, %v626_v50  ;;  %v631_v54 = vrot.slane %v622_v52, %v630_v51 }
  0x68   : > { %v634_v55 = vsel %vm369_vm0, %v627_v53, 0.0  ;;  %v635_v56 = vsel %vm369_vm0, %v631_v54, 0.0 }
  0x69   : > { %v636_v57 = vadd.f32 %v635_v56, %v634_v55 }
  0x6a   : > { %v652_v27 = vld [vmem:[%s1192_s22] sm:$0x1] }
  0x6b   : > { %637 = vadd.xlane.f32.xlu1 %v636_v57 }
  0xe5   : > { %v374_v58 = vpop.xlane.xlu0 %373 }
  0xe6   : > { %v375_v59 = vrot.slane %v374_v58, 4 }
  0xe8   : > { %v376_v1 = vadd.f32 %v375_v59, %v374_v58 }
  0xe9   : > { %v550_v61 = vpop.xlane.xlu1 %549 }
  0xea   : > { %v377_v60 = vrot.slane %v376_v1, 2  ;;  %v551_v0 = vrot.slane %v550_v61, 4 }
  0xec   : > { %v378_v62 = vadd.f32 %v377_v60, %v376_v1  ;;  %v552_v3 = vadd.f32 %v551_v0, %v550_v61 }
  0xee   : > { %v379_v2 = vrot.slane %v378_v62, 1  ;;  %v553_v4 = vrot.slane %v552_v3, 2 }
  0xf0   : > { %v380_v63 = vadd.f32 %v379_v2, %v378_v62  ;;  %v554_v8 = vadd.f32 %v553_v4, %v552_v3 }
  0xf1   : > { %v462_v5 = vpop.xlane.xlu0 %461 }
  0xf2   : > { %828 = vpush %v380_v63  ;;  %v463_v7 = vrot.slane %v462_v5, 4  ;;  %v555_v11 = vrot.slane %v554_v8, 1 }
  0xf4   : > { %v464_v15 = vadd.f32 %v463_v7, %v462_v5  ;;  %v556_v21 = vadd.f32 %v555_v11, %v554_v8 }
  0xf6   : > { %v465_v10 = vrot.slane %v464_v15, 2 }
  0xf8   : > { %v466_v18 = vadd.f32 %v465_v10, %v464_v15  ;;  %v638_v12 = vpop.xlane.xlu1 %637 }
  0xf9   : > { %v639_v14 = vrot.slane %v638_v12, 4 }
  0xfa   : > { %v467_v13 = vrot.slane %v466_v18, 1 }
  0xfb   : > { %v640_v17 = vadd.f32 %v639_v14, %v638_v12 }
  0xfc   : > { %v468_v16 = vadd.f32 %v467_v13, %v466_v18 }
  0xfd   : > { %v641_v22 = vrot.slane %v640_v17, 2 }
  0xfe   : > { %830 = vpush %v468_v16 }
  0xff   : > { %832 = vpush %v556_v21  ;;  %v642_v24 = vadd.f32 %v641_v22, %v640_v17 }
 0x101   : > { %v643_v25 = vrot.slane %v642_v24, 1 }
 0x103   : > { %v644_v26 = vadd.f32 %v643_v25, %v642_v24 }
 0x105   : > { %834 = vpush %v644_v26 }
 0x123   : > { %s829_s10 = spop %828 }
 0x12f   : > { %s831_s23 = spop %830 }
 0x130   : > { %s470_s24 = sadd.f32 %s831_s23, %s829_s10  ;;  %s833_s25 = spop %832 }
 0x132   : > { %s558_s26 = sadd.f32 %s833_s25, %s470_s24 }
 0x136   : > { %s835_s27 = spop %834 }
 0x137   : > { %s646_s28 = sadd.f32 %s835_s27, %s558_s26 }
 0x139   : > { %v653_v28 = vstv %s646_s28 }
 0x13a   : > { %v654_v29 = vadd.f32 %v653_v28, %v652_v27 }
 0x13c   : > { %655 = vst [vmem:[%s1192_s22] sm:$0x1] %v654_v29 }
 0x13d PF: > { %s30_s12 = sadd.s32 1, %s924_s12   ;;  %s1213_s10 = smov %s920_s11 }
 0x13e   : > { %p27_p6 = scmp.ge.s32.totalorder %s30_s12, 4   ;;  %s1214_s11 = smov %s1216_s2 }
 0x140   :  { %29 = sbr.rel (!%p27_p6) target bundleno = 37 (0x25), region = 72 }

</bundles_post_ra>
